<compile_context>
chip_gen: v6e
topology: v6e:2x2x1
jax: 0.10.0
libtpu: 0.0.40
codegen_flags: <defaults>
</compile_context>

<pallas_src>
import functools

import jax
import jax.numpy as jnp
from jax import lax
from jax.experimental import pallas as pl
from jax.experimental.pallas import tpu as pltpu


def _residual_sepconv_kernel(x_ref, dw_ref, pw_ref, bias_ref, o_ref, *, shifts):
    """One batch element per grid step.

    x_ref    : (1, Cp, Np)  zero-padded input, spatial flattened on the lane axis
    dw_ref   : (Cp, 9)      depthwise 3x3 weights, BN1 scale folded in
    pw_ref   : (Cp, Cp)     pointwise weights [c_out, c_in], BN2 scale folded in
    bias_ref : (Cp, 2)      column 0 = BN1 shift, column 1 = BN2 shift
    o_ref    : (1, Cp, Np)  output in the same padded/flattened layout
    """
    x = x_ref[0]                         # (Cp, Np) f32
    dw = dw_ref[...]                     # (Cp, 9)
    bias = bias_ref[...]                 # (Cp, 2)
    b1 = bias[:, 0:1]                    # (Cp, 1)
    b2 = bias[:, 1:2]                    # (Cp, 1)

    # Depthwise 3x3 dilated conv: center tap + 8 lane rotations (XLU) * VPU FMAs.
    acc = x * dw[:, 4:5]                 # tap (ky=1, kx=1) has shift 0
    for t, r in enumerate(shifts):
        if t == 4:                       # center tap handled above
            continue
        acc = acc + pltpu.roll(x, shift=r, axis=1) * dw[:, t:t + 1]

    # BN1 shift (scale already folded into dw) + ReLU.
    act = jnp.maximum(acc + b1, 0.0)

    # Pointwise 1x1 conv as (Cp, Cp) @ (Cp, Np): lane-dense N dimension on MXU.
    h = jnp.dot(pw_ref[...], act, preferred_element_type=jnp.float32)

    # BN2 shift (scale folded into pw), Dropout2d(p=0) identity, residual + ReLU.
    o_ref[0] = jnp.maximum(x + h + b2, 0.0)


def residual_conv_module(x_nchw, params, *, dilation):
    """Pallas forward of ResidualConvModule. x_nchw: (B, C, H, W) float32."""
    B, C, H, W = x_nchw.shape
    d = dilation
    eps = 1e-3                                        # nn.BatchNorm2d(eps=0.001)
    Hp, Wp = H + 2 * d, W + 2 * d
    Np = pl.cdiv(Hp * Wp, 128) * 128                  # lane-dense last dim
    Cp = pl.cdiv(C, 8) * 8                            # sublane-aligned channels

    # Zero-pad spatially, flatten spatial onto the lane axis, pad lanes to Np
    # and channels to Cp.  For valid output positions the taps never touch the
    # lane-pad region, and padded channels stay identically zero.
    x = x_nchw.astype(jnp.float32)
    x_pad = jnp.pad(x, ((0, 0), (0, C - C + (Cp - C)), (d, d), (d, d)))  # (B,Cp,Hp,Wp)
    x_flat = x_pad.reshape(B, Cp, Hp * Wp)
    x_flat = jnp.pad(x_flat, ((0, 0), (0, 0), (0, Np - Hp * Wp)))        # (B,Cp,Np)

    def fold_bn(gamma, beta, mean, var):
        scale = gamma / jnp.sqrt(var + eps)
        shift = beta - mean * scale
        return scale, shift

    s1, b1 = fold_bn(params["bn1_gamma"], params["bn1_beta"],
                     params["bn1_mean"], params["bn1_var"])
    s2, b2 = fold_bn(params["bn2_gamma"], params["bn2_beta"],
                     params["bn2_mean"], params["bn2_var"])

    # Depthwise weight: torch (C,1,3,3) -> (C,9); fold BN1 scale per channel.
    dw = params["dw_weight"][:, 0].reshape(C, 9) * s1[:, None]
    # Pointwise weight: torch (Cout,Cin,1,1) -> (Cout,Cin); fold BN2 scale per out ch.
    pw = params["pw_weight"][:, :, 0, 0] * s2[:, None]
    bias = jnp.stack([b1, b2], axis=1)                               # (C, 2)

    # Zero-pad weights to the sublane-aligned channel count.
    dw = jnp.pad(dw, ((0, Cp - C), (0, 0)))
    pw = jnp.pad(pw, ((0, Cp - C), (0, Cp - C)))
    bias = jnp.pad(bias, ((0, Cp - C), (0, 0)))

    # Tap (ky,kx) reads flat index p + (ky-1)*d*Wp + (kx-1)*d; roll by the negative.
    shifts = tuple((-((ky - 1) * d * Wp + (kx - 1) * d)) % Np
                   for ky in range(3) for kx in range(3))

    kernel = functools.partial(_residual_sepconv_kernel, shifts=shifts)

    out_flat = pl.pallas_call(
        kernel,
        out_shape=jax.ShapeDtypeStruct((B, Cp, Np), jnp.float32),
        grid_spec=pltpu.PrefetchScalarGridSpec(
            num_scalar_prefetch=0,
            grid=(B,),
            in_specs=[
                pl.BlockSpec((1, Cp, Np), lambda b: (b, 0, 0)),
                pl.BlockSpec((Cp, 9), lambda b: (0, 0)),
                pl.BlockSpec((Cp, Cp), lambda b: (0, 0)),
                pl.BlockSpec((Cp, 2), lambda b: (0, 0)),
            ],
            out_specs=pl.BlockSpec((1, Cp, Np), lambda b: (b, 0, 0)),
        ),
        compiler_params=pltpu.CompilerParams(
            dimension_semantics=("parallel",)),
    )(x_flat, dw, pw, bias)

    # Un-flatten, crop channel pad and the spatial padding ring (cheap XLA glue).
    out = out_flat[:, :C, :Hp * Wp].reshape(B, C, Hp, Wp)
    return out[:, :, d:d + H, d:d + W]


def _reference(x_nchw, params, *, dilation):
    """Pure-JAX reference (lax conv) for verification, NCHW throughout."""
    d = dilation
    eps = 1e-3
    C = x_nchw.shape[1]
    x = x_nchw.astype(jnp.float32)

    # Depthwise (groups=C): OIHW rhs of shape (C,1,3,3).
    h = lax.conv_general_dilated(
        x, params["dw_weight"], window_strides=(1, 1),
        padding=[(d, d), (d, d)], rhs_dilation=(d, d),
        feature_group_count=C,
        dimension_numbers=("NCHW", "OIHW", "NCHW"))

    def bn(t, g, b_, m, v):
        g, b_, m, v = (a.reshape(1, C, 1, 1) for a in (g, b_, m, v))
        return (t - m) / jnp.sqrt(v + eps) * g + b_

    h = bn(h, params["bn1_gamma"], params["bn1_beta"],
           params["bn1_mean"], params["bn1_var"])
    h = jax.nn.relu(h)
    pw = params["pw_weight"][:, :, 0, 0]                              # (Cout,Cin)
    h = jnp.einsum("oc,bchw->bohw", pw, h)
    h = bn(h, params["bn2_gamma"], params["bn2_beta"],
           params["bn2_mean"], params["bn2_var"])
    return jax.nn.relu(x + h)


if __name__ == "__main__":
    B, C, H, W = 2, 8, 16, 16
    DILATION = 2

    key = jax.random.PRNGKey(0)
    keys = jax.random.split(key, 12)

    x = jax.random.normal(keys[0], (B, C, H, W), jnp.float32)

    params = {
        "dw_weight": 0.3 * jax.random.normal(keys[1], (C, 1, 3, 3), jnp.float32),
        "pw_weight": 0.3 * jax.random.normal(keys[2], (C, C, 1, 1), jnp.float32),
        "bn1_gamma": 1.0 + 0.1 * jax.random.normal(keys[3], (C,), jnp.float32),
        "bn1_beta": 0.1 * jax.random.normal(keys[4], (C,), jnp.float32),
        "bn1_mean": 0.1 * jax.random.normal(keys[5], (C,), jnp.float32),
        "bn1_var": jax.random.uniform(keys[6], (C,), jnp.float32, 0.5, 1.5),
        "bn2_gamma": 1.0 + 0.1 * jax.random.normal(keys[7], (C,), jnp.float32),
        "bn2_beta": 0.1 * jax.random.normal(keys[8], (C,), jnp.float32),
        "bn2_mean": 0.1 * jax.random.normal(keys[9], (C,), jnp.float32),
        "bn2_var": jax.random.uniform(keys[10], (C,), jnp.float32, 0.5, 1.5),
    }

    out = residual_conv_module(x, params, dilation=DILATION)
    out = jax.block_until_ready(out)

    ref = jax.block_until_ready(_reference(x, params, dilation=DILATION))
    assert out.shape == (B, C, H, W), out.shape
    assert jnp.allclose(out, ref, atol=1e-3, rtol=1e-3), float(
        jnp.max(jnp.abs(out - ref)))

    print("KERNEL_OK")
</pallas_src>

<mosaic_0001>
module attributes {stable_mosaic.version = 11 : i64} {
  func.func @_residual_sepconv_kernel(%arg0: i32, %arg1: memref<1x8x512xf32, #tpu.memory_space<vmem>>, %arg2: memref<8x9xf32, #tpu.memory_space<vmem>>, %arg3: memref<8x8xf32, #tpu.memory_space<vmem>>, %arg4: memref<8x2xf32, #tpu.memory_space<vmem>>, %arg5: memref<1x8x512xf32, #tpu.memory_space<vmem>>) attributes {dimension_semantics = [#tpu.dimension_semantics<parallel>], iteration_bounds = array<i64: 2>, scalar_prefetch = 0 : i64, scratch_operands = 0 : i64, tpu.core_type = #tpu.core_type<tc>, window_params = [{transform_indices = @transform_0, window_bounds = array<i64: 1, 8, 512>}, {pipeline_mode = #tpu.pipeline_mode<synchronous>, transform_indices = @transform_1, window_bounds = array<i64: 8, 9>}, {pipeline_mode = #tpu.pipeline_mode<synchronous>, transform_indices = @transform_2, window_bounds = array<i64: 8, 8>}, {pipeline_mode = #tpu.pipeline_mode<synchronous>, transform_indices = @transform_3, window_bounds = array<i64: 8, 2>}, {transform_indices = @transform_4, window_bounds = array<i64: 1, 8, 512>}]} {
    %c0 = arith.constant 0 : index
    %c0_0 = arith.constant 0 : index
    %c0_1 = arith.constant 0 : index
    %0 = vector.load %arg1[%c0, %c0_0, %c0_1] : memref<1x8x512xf32, #tpu.memory_space<vmem>>, vector<1x8x512xf32>
    %1 = vector.shape_cast %0 : vector<1x8x512xf32> to vector<8x512xf32>
    %c0_2 = arith.constant 0 : index
    %c0_3 = arith.constant 0 : index
    %2 = vector.load %arg2[%c0_2, %c0_3] : memref<8x9xf32, #tpu.memory_space<vmem>>, vector<8x9xf32>
    %c0_4 = arith.constant 0 : index
    %c0_5 = arith.constant 0 : index
    %3 = vector.load %arg4[%c0_4, %c0_5] : memref<8x2xf32, #tpu.memory_space<vmem>>, vector<8x2xf32>
    %4 = vector.extract_strided_slice %3 {offsets = [0, 0], sizes = [8, 1], strides = [1, 1]} : vector<8x2xf32> to vector<8x1xf32>
    %5 = vector.extract_strided_slice %3 {offsets = [0, 1], sizes = [8, 1], strides = [1, 1]} : vector<8x2xf32> to vector<8x1xf32>
    %6 = vector.extract_strided_slice %2 {offsets = [0, 4], sizes = [8, 1], strides = [1, 1]} : vector<8x9xf32> to vector<8x1xf32>
    %7 = vector.broadcast %6 : vector<8x1xf32> to vector<8x512xf32>
    %8 = arith.mulf %1, %7 : vector<8x512xf32>
    %c42_i32 = arith.constant 42 : i32
    %9 = tpu.dynamic_rotate %1 by %c42_i32 dim 1 : vector<8x512xf32>, i32 -> vector<8x512xf32>
    %10 = vector.extract_strided_slice %2 {offsets = [0, 0], sizes = [8, 1], strides = [1, 1]} : vector<8x9xf32> to vector<8x1xf32>
    %11 = vector.broadcast %10 : vector<8x1xf32> to vector<8x512xf32>
    %12 = arith.mulf %9, %11 : vector<8x512xf32>
    %13 = arith.addf %8, %12 : vector<8x512xf32>
    %c40_i32 = arith.constant 40 : i32
    %14 = tpu.dynamic_rotate %1 by %c40_i32 dim 1 : vector<8x512xf32>, i32 -> vector<8x512xf32>
    %15 = vector.extract_strided_slice %2 {offsets = [0, 1], sizes = [8, 1], strides = [1, 1]} : vector<8x9xf32> to vector<8x1xf32>
    %16 = vector.broadcast %15 : vector<8x1xf32> to vector<8x512xf32>
    %17 = arith.mulf %14, %16 : vector<8x512xf32>
    %18 = arith.addf %13, %17 : vector<8x512xf32>
    %c38_i32 = arith.constant 38 : i32
    %19 = tpu.dynamic_rotate %1 by %c38_i32 dim 1 : vector<8x512xf32>, i32 -> vector<8x512xf32>
    %20 = vector.extract_strided_slice %2 {offsets = [0, 2], sizes = [8, 1], strides = [1, 1]} : vector<8x9xf32> to vector<8x1xf32>
    %21 = vector.broadcast %20 : vector<8x1xf32> to vector<8x512xf32>
    %22 = arith.mulf %19, %21 : vector<8x512xf32>
    %23 = arith.addf %18, %22 : vector<8x512xf32>
    %c2_i32 = arith.constant 2 : i32
    %24 = tpu.dynamic_rotate %1 by %c2_i32 dim 1 : vector<8x512xf32>, i32 -> vector<8x512xf32>
    %25 = vector.extract_strided_slice %2 {offsets = [0, 3], sizes = [8, 1], strides = [1, 1]} : vector<8x9xf32> to vector<8x1xf32>
    %26 = vector.broadcast %25 : vector<8x1xf32> to vector<8x512xf32>
    %27 = arith.mulf %24, %26 : vector<8x512xf32>
    %28 = arith.addf %23, %27 : vector<8x512xf32>
    %c510_i32 = arith.constant 510 : i32
    %29 = tpu.dynamic_rotate %1 by %c510_i32 dim 1 : vector<8x512xf32>, i32 -> vector<8x512xf32>
    %30 = vector.extract_strided_slice %2 {offsets = [0, 5], sizes = [8, 1], strides = [1, 1]} : vector<8x9xf32> to vector<8x1xf32>
    %31 = vector.broadcast %30 : vector<8x1xf32> to vector<8x512xf32>
    %32 = arith.mulf %29, %31 : vector<8x512xf32>
    %33 = arith.addf %28, %32 : vector<8x512xf32>
    %c474_i32 = arith.constant 474 : i32
    %34 = tpu.dynamic_rotate %1 by %c474_i32 dim 1 : vector<8x512xf32>, i32 -> vector<8x512xf32>
    %35 = vector.extract_strided_slice %2 {offsets = [0, 6], sizes = [8, 1], strides = [1, 1]} : vector<8x9xf32> to vector<8x1xf32>
    %36 = vector.broadcast %35 : vector<8x1xf32> to vector<8x512xf32>
    %37 = arith.mulf %34, %36 : vector<8x512xf32>
    %38 = arith.addf %33, %37 : vector<8x512xf32>
    %c472_i32 = arith.constant 472 : i32
    %39 = tpu.dynamic_rotate %1 by %c472_i32 dim 1 : vector<8x512xf32>, i32 -> vector<8x512xf32>
    %40 = vector.extract_strided_slice %2 {offsets = [0, 7], sizes = [8, 1], strides = [1, 1]} : vector<8x9xf32> to vector<8x1xf32>
    %41 = vector.broadcast %40 : vector<8x1xf32> to vector<8x512xf32>
    %42 = arith.mulf %39, %41 : vector<8x512xf32>
    %43 = arith.addf %38, %42 : vector<8x512xf32>
    %c470_i32 = arith.constant 470 : i32
    %44 = tpu.dynamic_rotate %1 by %c470_i32 dim 1 : vector<8x512xf32>, i32 -> vector<8x512xf32>
    %45 = vector.extract_strided_slice %2 {offsets = [0, 8], sizes = [8, 1], strides = [1, 1]} : vector<8x9xf32> to vector<8x1xf32>
    %46 = vector.broadcast %45 : vector<8x1xf32> to vector<8x512xf32>
    %47 = arith.mulf %44, %46 : vector<8x512xf32>
    %48 = arith.addf %43, %47 : vector<8x512xf32>
    %49 = vector.broadcast %4 : vector<8x1xf32> to vector<8x512xf32>
    %50 = arith.addf %48, %49 : vector<8x512xf32>
    %cst = arith.constant 0.000000e+00 : f32
    %51 = vector.broadcast %cst : f32 to vector<8x512xf32>
    %52 = arith.maximumf %50, %51 : vector<8x512xf32>
    %c0_6 = arith.constant 0 : index
    %c0_7 = arith.constant 0 : index
    %53 = vector.load %arg3[%c0_6, %c0_7] : memref<8x8xf32, #tpu.memory_space<vmem>>, vector<8x8xf32>
    %cst_8 = arith.constant dense<0.000000e+00> : vector<8x512xf32>
    %54 = tpu.matmul %53, %52, %cst_8 {dimension_numbers = #tpu.dot_dimension_numbers<[1], [0], [0], [1], [0, 0, 1, 1], [], []>} : vector<8x8xf32>, vector<8x512xf32>, vector<8x512xf32> -> vector<8x512xf32>
    %55 = arith.addf %1, %54 : vector<8x512xf32>
    %56 = vector.broadcast %5 : vector<8x1xf32> to vector<8x512xf32>
    %57 = arith.addf %55, %56 : vector<8x512xf32>
    %cst_9 = arith.constant 0.000000e+00 : f32
    %58 = vector.broadcast %cst_9 : f32 to vector<8x512xf32>
    %59 = arith.maximumf %57, %58 : vector<8x512xf32>
    %c0_10 = arith.constant 0 : index
    %c0_11 = arith.constant 0 : index
    %c0_12 = arith.constant 0 : index
    %60 = vector.load %arg5[%c0_10, %c0_11, %c0_12] : memref<1x8x512xf32, #tpu.memory_space<vmem>>, vector<1x8x512xf32>
    %61 = vector.shape_cast %60 : vector<1x8x512xf32> to vector<8x512xf32>
    %62 = vector.shape_cast %59 : vector<8x512xf32> to vector<1x8x512xf32>
    tpu.vector_store %arg5[%c0_10, %c0_11, %c0_12], %62 {strides = array<i32>} : memref<1x8x512xf32, #tpu.memory_space<vmem>>, vector<1x8x512xf32>,
    return
  }
  func.func @transform_0(%arg0: i32) -> (i32, i32, i32) {
    %c0_i32 = arith.constant 0 : i32
    %c0_i32_0 = arith.constant 0 : i32
    %c0_i32_1 = arith.constant 0 : i32
    return %arg0, %c0_i32, %c0_i32_0 : i32, i32, i32
  }
  func.func @transform_1(%arg0: i32) -> (i32, i32) {
    %c0_i32 = arith.constant 0 : i32
    %c0_i32_0 = arith.constant 0 : i32
    %c0_i32_1 = arith.constant 0 : i32
    return %c0_i32, %c0_i32_0 : i32, i32
  }
  func.func @transform_2(%arg0: i32) -> (i32, i32) {
    %c0_i32 = arith.constant 0 : i32
    %c0_i32_0 = arith.constant 0 : i32
    %c0_i32_1 = arith.constant 0 : i32
    return %c0_i32, %c0_i32_0 : i32, i32
  }
  func.func @transform_3(%arg0: i32) -> (i32, i32) {
    %c0_i32 = arith.constant 0 : i32
    %c0_i32_0 = arith.constant 0 : i32
    %c0_i32_1 = arith.constant 0 : i32
    return %c0_i32, %c0_i32_0 : i32, i32
  }
  func.func @transform_4(%arg0: i32) -> (i32, i32, i32) {
    %c0_i32 = arith.constant 0 : i32
    %c0_i32_0 = arith.constant 0 : i32
    %c0_i32_1 = arith.constant 0 : i32
    return %arg0, %c0_i32, %c0_i32_0 : i32, i32, i32
  }
}

</mosaic_0001>

<bundles_post_ra>
// kernel: tpu_custom_call.1
= control target key start
LH: loop header
LB: loop body
LE: loop exit
PB: predicated region body
PF: predicated region fallthrough
CT: control target
= control target key end

     0   :  { %9 = vsyncpa [#allocation3], 0  ;;  %s1298_s0 = inlined_call_operand.hbm [shape: f32[2,8,512], index: 0, kind: input, shape index: {}]   ;;  %s1299_s1 = inlined_call_operand.vmem [shape: f32[8,9], index: 1, kind: input, shape index: {}]   ;;  %s1300_s2 = inlined_call_operand.hbm [shape: f32[8,8], index: 2, kind: input, shape index: {}]   ;;  %s1301_s3 = inlined_call_operand.vmem [shape: f32[8,2], index: 3, kind: input, shape index: {}]   ;;  %s1302_s4 = inlined_call_operand.hbm [shape: f32[2,8,512], index: 4, kind: output, shape index: {}]  }
   0x1   :  { %11 = vsyncpa [#allocation3 + $0x1], 0 }
   0x2   :  { %12 = vsyncpa [#allocation6], 0 }
   0x3   :  { %13 = vsyncpa [#allocation4], 0 }
   0x4   :  { %15 = vsyncpa [#allocation4 + $0x1], 0  ;;  %s995_s15 = smov 0   ;;  %s997_s16 = smov 0  }
   0x5   :  { %s999_s17 = smov 0   ;;  %s1001_s18 = smov 0  }
   0x6 LB: > { %s1016_s19 = sadd.s32 4294967295, %s947_s18   ;;  %s719_s20 = sadd.s32 4294967294, %s947_s18   ;;  %s947_s18 = sphi %s1001_s18, %s1325_s18   ;;  %s943_s17 = sphi %s999_s17, %s1324_s17   ;;  %s939_s16 = sphi %s997_s16, %s1323_s16   ;;  %s935_s15 = sphi %s995_s15, %s1322_s15  }
   0x7   : > { %p41_p0 = scmp.ne.s32.totalorder %s939_s16, %s935_s15  ;;  %p1303_p1 = scmp.eq.s32.totalorder %s1016_s19, 0 }
   0x8   : > { %p134_p3 = scmp.eq.s32.totalorder %s719_s20, 1  ;;  %p720_p5 = scmp.ge.s32.totalorder %s947_s18, 1 }
   0x9   : > { %p1025_p4 = por %p1303_p1, %p41_p0  ;;  %p141_p7 = scmp.lt.s32.totalorder %s947_s18, 3 }
   0xa   : > { %p1030_p6 = por %p134_p3, %p41_p0  ;;  %s949_s24 = smov [#allocation5]  }
   0xb   : > { %s1307_s21 = scalar_select %p1025_p4, 1, 0 }
   0xc   : > { %s1308_s22 = scalar_select %p1030_p6, 1, 0 }
   0xd   : > { %p1035_p8 = pnand %p720_p5, %p141_p7  ;;  %s157_s25 = sshll.u32 %s949_s24, 4  ;;  %s158_s25 = int_to_ptr.vmem [resolvable:$true] %s157_s25 }
   0xe   : > { %s1043_s26 = sadd.s32 1, %s947_s18   ;;  %s28_s30 = sadd.s32 1, %s943_s17 }
   0xf   : > { %s1309_s23 = scalar_select %p1035_p8, 1, 0 }
  0x10   : > { %p747_p10 = pneg %p1035_p8  ;;  %s25_s28 = ssub.s32 %s947_s18, %s1043_s26 }
  0x11   : > { %p1053_p12 = scmp.eq.s32.totalorder %s25_s28, 0  ;;  %p35_p13 = scmp.ne.s32.totalorder %s943_s17, %s939_s16 }
  0x12   : > { %p1047_p11 = pnand %p747_p10, %p1303_p1  ;;  %s836_s5 = scalar_lea.vmem %s158_s25, 128 }
  0x13   : > { %p837_p3 = scmp.ne.s32.totalorder %s158_s25, %s836_s5  ;;  %p844_p9 = scmp.lt.s32.totalorder %s158_s25, %s158_s25 }
  0x14   : > { %p827_p0 = pneg %p1047_p11  ;;  %p845_p2 = scmp.lt.s32.totalorder %s836_s5, %s836_s5 }
  0x16   : > { %p839_p5 = pnand %p837_p3, %p827_p0  ;;  %p846_p10 = por %p845_p2, %p844_p9 }
  0x18   : > { %p840_p7 = pneg %p839_p5 }
  0x1a   : > { %p847_p1 = pnand %p846_p10, %p840_p7 }
  0x1c   : > { %850 = shalt.err (!%p847_p1)
}
  0x1d   : > { %750 = dma.hbm_to_vmem [thread:$0]  (!%p1047_p11), %s1300_s2, 128, %s158_s25, [#allocation6]  }
  0x1e   : > { %s1070_s8 = scalar_select %p1053_p12, %s943_s17, %s28_s30  }
  0x1f   : > { %p36_p1 = scmp.eq.s32.totalorder %s947_s18, 0  ;;  %p1312_p2 = scmp.eq.s32.totalorder %s1016_s19, 1 }
  0x20   : > { %p760_p0 = scmp.lt.s32.totalorder %s947_s18, 2  ;;  %s171_s10 = sand.u32 1, %s943_s17  }
  0x21   : > { %p1078_p9 = por %p1312_p2, %p35_p13  ;;  %p37_p3 = por %p36_p1, %p35_p13 }
  0x22   : > { %s723_s11 = sshll.u32 %s171_s10, 5  ;;  %s737_s12 = sshll.u32 %s947_s18, 9 }
  0x23   : > { %s1313_s9 = scalar_select %p1078_p9, 1, 0 }
  0x24   : > { %s1091_s20 = scalar_lea.hbm %s1298_s0, %s737_s12  ;;  %s175_s24 = scalar_lea.vmem [#allocation2], %s723_s11 }
  0x25   : > { %s183_s25 = sshll.u32 %s175_s24, 4  ;;  %p1093_p11 = pnand %p760_p0, %p37_p3  ;;  %s184_s25 = int_to_ptr.vmem [resolvable:$true] %s183_s25 }
  0x26   : > { %s172_s28 = scalar_lea.sflag [#allocation3], %s171_s10  ;;  %s851_s29 = scalar_lea.hbm %s1091_s20, 512 }
  0x27   : > { %p852_p12 = scmp.ne.s32.totalorder %s1091_s20, %s851_s29  ;;  %p853_p13 = pneg %p1093_p11 }
  0x28   : > { %s856_s6 = scalar_lea.hbm %s1298_s0, 1024  ;;  %p857_p10 = scmp.lt.s32.totalorder %s1091_s20, %s1298_s0 }
  0x29   : > { %p854_p5 = pnand %p853_p13, %p852_p12  ;;  %p858_p1 = scmp.lt.s32.totalorder %s856_s6, %s851_s29 }
  0x2b   : > { %p855_p7 = pneg %p854_p5  ;;  %p859_p2 = por %p858_p1, %p857_p10 }
  0x2d   : > { %p860_p0 = pnand %p859_p2, %p855_p7 }
  0x2f   : > { %863 = shalt.err (!%p860_p0)
}
  0x30   : > { %s864_s12 = scalar_lea.vmem %s184_s25, 512  ;;  %s950_s10 = smov [#allocation2]  }
  0x31   : > { %p865_p3 = scmp.ne.s32.totalorder %s184_s25, %s864_s12  ;;  %s869_s13 = sshll.u32 %s950_s10, 4  ;;  %s870_s13 = int_to_ptr.vmem [resolvable:$false] %s869_s13 }
  0x32   : > { %s871_s14 = scalar_lea.vmem %s870_s13, 1024  ;;  %p872_p12 = scmp.lt.s32.totalorder %s184_s25, %s870_s13 }
  0x33   : > { %p867_p6 = pnand %p865_p3, %p853_p13  ;;  %p873_p5 = scmp.lt.s32.totalorder %s871_s14, %s864_s12 }
  0x35   : > { %p868_p9 = pneg %p867_p6  ;;  %p874_p4 = por %p873_p5, %p872_p12 }
  0x37   : > { %p875_p8 = pnand %p874_p4, %p868_p9 }
  0x39   : > { %878 = shalt.err (!%p875_p8)
}
  0x3a   : > { %754 = dma.hbm_to_vmem [thread:$0]  (!%p1093_p11), %s1091_s20, 512, %s184_s25, %s172_s28  }
  0x3b   : > { %p1315_p7 = scmp.ne.s32.totalorder %s1309_s23, 0 }
  0x3c   : > { %s1114_s24 = sand.u32 (!%p1315_p7), 1, %s939_s16   ;;  %p1316_p4 = scmp.ne.s32.totalorder (!%p1315_p7), %s1307_s21, 0 }
  0x3d   : > { %192 = sbr.rel (%p1315_p7) target bundleno = 513 (0x201), region = 36  ;;  %s727_s29 = sshll.u32 (!%p1315_p7), %s1114_s24, 5 }
  0x3e   : > { %s195_s30 = scalar_lea.sflag (!%p1315_p7), [#allocation3], %s1114_s24  ;;  %s198_s5 = scalar_lea.vmem (!%p1315_p7), [#allocation2], %s727_s29 }
  0x42   : > { %922 = dma.done.wait (%p1316_p4), %s195_s30, 512  }
  0x43   : > { %924 = vsyncadd (%p1316_p4), %s195_s30, 4294966784  ;;  %p1317_p6 = scmp.eq.s32.totalorder %s1016_s19, 0 }
  0x45   : > { %926 = dma.done.wait (%p1317_p6), [#allocation6], 128   ;;  %p1318_p8 = pmov %p1317_p6 }
  0x46   : > { %v951_v0 = vmov 1   ;;  %v952_v1 = vmov 4   ;;  %v231_v2 = vld [vmem:[%s1299_s1] sm:$0xff]  ;;  %v953_v4 = vmov 0   ;;  %s954_s21 = smov 42   ;;  %v1135_v5 = vld [vmem:[%s198_s5 + $0x8] sm:$0xff]  ;;  %v250_v16 = vlaneseq }
  0x47   : > { %928 = vsyncadd (%p1318_p8), [#allocation6], 4294967168  ;;  %816 = vset.pattern.permute.xlu1 %v951_v0  ;;  %814 = vset.pattern.permute.xlu0 %v952_v1  ;;  %v1132_v3 = vld [vmem:[%s198_s5] sm:$0xff]  ;;  %v1137_v6 = vld [vmem:[%s198_s5 + $0x10] sm:$0xff]  ;;  %v955_v8 = vmov 2   ;;  %s956_s25 = smov 40  }
  0x48   : > { %283 = vperm.xlu1 %816, %v231_v2   ;;  %235 = vperm.xlu0 %814, %v231_v2   ;;  %v1141_v7 = vld [vmem:[%s198_s5 + $0x18] sm:$0xff]  ;;  %v957_v9 = vmov 3   ;;  %s958_s27 = smov 38   ;;  %v959_v10 = vmov 5   ;;  %s960_s28 = smov 2   ;;  %v961_v11 = vmov 6  }
  0x49   : > { %s962_s6 = smov 126   ;;  %v963_v12 = vmov 7   ;;  %s964_s7 = smov 90   ;;  %v965_v13 = vmov 8   ;;  %v232_v14 = vld [vmem:[%s1301_s3] sm:$0xff]  ;;  %v968_v15 = vmov 0.0  }
  0x4a   : > { %s966_s11 = smov 88   ;;  %s967_s12 = smov 86   ;;  %526 = vmatprep.mubr.f32.mxu0 %v968_v15  ;;  %597 = vmatprep.mubr.f32.mxu1 %v968_v15  ;;  %v1176_v19 = vand.u32 127, %v250_v16  ;;  %vm458_vm8 = vcmask 64512  }
  0x4b   : > { %s226_s14 = scalar_lea.vmem [#allocation7], %s727_s29  ;;  %s738_s30 = sshll.u32 %s1016_s19, 9 }
  0x4c   : > { %815 = vset.pattern.permute.xlu0 %v953_v4  ;;  %242 = vrot.lane.b32.xlu1 %v1132_v3, %s954_s21  ;;  %vm252_vm0 = vcmp.lt.s32.totalorder %v1176_v19, 42  ;;  %vm277_vm1 = vcmp.lt.s32.totalorder %v1176_v19, 40  ;;  %vm302_vm2 = vcmp.lt.s32.totalorder %v1176_v19, 38  ;;  %vm327_vm3 = vcmp.lt.s32.totalorder %v1176_v19, 2  ;;  %s639_s5 = sshll.u32 %s226_s14, 4  ;;  %s625_s29 = scalar_lea.sflag [#allocation4], %s1114_s24  ;;  %s640_s5 = int_to_ptr.vmem [resolvable:$true] %s639_s5 }
  0x4d   : > { %258 = vperm.xlu0 %815, %v231_v2   ;;  %vm352_vm4 = vcmp.lt.s32.totalorder %v1176_v19, 126  ;;  %vm377_vm5 = vcmp.lt.s32.totalorder %v1176_v19, 90  ;;  %vm402_vm6 = vcmp.lt.s32.totalorder %v1176_v19, 88  ;;  %vm427_vm7 = vcmp.lt.s32.totalorder %v1176_v19, 86  ;;  %p1319_p11 = scmp.ne.s32.totalorder %s1313_s9, 0 }
  0x50   : > { %244 = vrot.lane.b32.xlu1 %v1135_v5, %s954_s21 }
  0x51   : > { %246 = vrot.lane.b32.xlu0 %v1137_v6, %s954_s21 }
  0x52   : > { %817 = vset.pattern.permute.xlu0 %v955_v8 }
  0x54   : > { %248 = vrot.lane.b32.xlu1 %v1141_v7, %s954_s21  ;;  %s637_s21 = scalar_lea.hbm %s1302_s4, %s738_s30 }
  0x55   : > { %308 = vperm.xlu0 %817, %v231_v2  }
  0x58   : > { %269 = vrot.lane.b32.xlu1 %v1132_v3, %s956_s25 }
  0x59   : > { %273 = vrot.lane.b32.xlu0 %v1137_v6, %s956_s25 }
  0x5a   : > { %818 = vset.pattern.permute.xlu0 %v957_v9 }
  0x5c   : > { %271 = vrot.lane.b32.xlu1 %v1135_v5, %s956_s25 }
  0x5d   : > { %333 = vperm.xlu0 %818, %v231_v2  }
  0x60   : > { %275 = vrot.lane.b32.xlu1 %v1141_v7, %s956_s25  ;;  %s879_s25 = scalar_lea.vmem %s640_s5, 512 }
  0x61   : > { %298 = vrot.lane.b32.xlu0 %v1137_v6, %s958_s27  ;;  %p880_p9 = scmp.ne.s32.totalorder %s640_s5, %s879_s25 }
  0x62   : > { %819 = vset.pattern.permute.xlu0 %v959_v10 }
  0x63   : > { %p881_p13 = pnand %p880_p9, %p1319_p11 }
  0x64   : > { %294 = vrot.lane.b32.xlu1 %v1132_v3, %s958_s27 }
  0x65   : > { %358 = vperm.xlu0 %819, %v231_v2   ;;  %p882_p10 = pneg %p881_p13 }
  0x68   : > { %296 = vrot.lane.b32.xlu1 %v1135_v5, %s958_s27 }
  0x69   : > { %323 = vrot.lane.b32.xlu0 %v1137_v6, %s960_s28 }
  0x6a   : > { %820 = vset.pattern.permute.xlu0 %v961_v11 }
  0x6c   : > { %300 = vrot.lane.b32.xlu1 %v1141_v7, %s958_s27  ;;  %s969_s27 = smov [#allocation7]  }
  0x6d   : > { %383 = vperm.xlu0 %820, %v231_v2   ;;  %s883_s19 = sshll.u32 %s969_s27, 4  ;;  %s884_s19 = int_to_ptr.vmem [resolvable:$false] %s883_s19 }
  0x6e   : > { %p886_p1 = scmp.lt.s32.totalorder %s640_s5, %s884_s19 }
  0x70   : > { %319 = vrot.lane.b32.xlu1 %v1132_v3, %s960_s28 }
  0x71   : > { %348 = vrot.lane.b32.xlu0 %v1137_v6, %s962_s6 }
  0x72   : > { %821 = vset.pattern.permute.xlu0 %v963_v12 }
  0x74   : > { %321 = vrot.lane.b32.xlu1 %v1135_v5, %s960_s28 }
  0x75   : > { %408 = vperm.xlu0 %821, %v231_v2  }
  0x78   : > { %325 = vrot.lane.b32.xlu1 %v1141_v7, %s960_s28  ;;  %s885_s28 = scalar_lea.vmem %s884_s19, 1024 }
  0x79   : > { %373 = vrot.lane.b32.xlu0 %v1137_v6, %s964_s7  ;;  %p887_p2 = scmp.lt.s32.totalorder %s885_s28, %s879_s25 }
  0x7a   : > { %822 = vset.pattern.permute.xlu0 %v965_v13 }
  0x7b   : > { %p888_p0 = por %p887_p2, %p886_p1 }
  0x7c   : > { %344 = vrot.lane.b32.xlu1 %v1132_v3, %s962_s6 }
  0x7d   : > { %433 = vperm.xlu0 %822, %v231_v2   ;;  %p889_p3 = pnand %p888_p0, %p882_p10 }
  0x80   : > { %346 = vrot.lane.b32.xlu1 %v1135_v5, %s962_s6 }
  0x81   : > { %398 = vrot.lane.b32.xlu0 %v1137_v6, %s966_s11 }
  0x82   : > { %823 = vset.pattern.permute.xlu0 %v953_v4 }
  0x84   : > { %350 = vrot.lane.b32.xlu1 %v1141_v7, %s962_s6 }
  0x85   : > { %419 = vrot.lane.b32.xlu0 %v1132_v3, %s967_s12 }
  0x88   : > { %369 = vrot.lane.b32.xlu1 %v1132_v3, %s964_s7 }
  0x89   : > { %423 = vrot.lane.b32.xlu0 %v1137_v6, %s967_s12 }
  0x8c   : > { %371 = vrot.lane.b32.xlu1 %v1135_v5, %s964_s7 }
  0x8d   : > { %446 = vperm.xlu0 %823, %v232_v14  }
  0x90   : > { %375 = vrot.lane.b32.xlu1 %v1141_v7, %s964_s7 }
  0x91   : > { %824 = vset.pattern.permute.xlu0 %v951_v0 }
  0x94   : > { %394 = vrot.lane.b32.xlu1 %v1132_v3, %s966_s11 }
  0x98   : > { %396 = vrot.lane.b32.xlu1 %v1135_v5, %s966_s11 }
  0x9c   : > { %400 = vrot.lane.b32.xlu1 %v1141_v7, %s966_s11 }
  0xa0   : > { %421 = vrot.lane.b32.xlu1 %v1135_v5, %s967_s12 }
  0xa4   : > { %425 = vrot.lane.b32.xlu1 %v1141_v7, %s967_s12 }
  0xa8   : > { %609 = vperm.xlu1 %816, %v232_v14  }
  0xc3   : > { %v284_v17 = vpop.permute.xlu1 %283  ;;  %v236_v18 = vpop.permute.xlu0 %235 }
  0xc4   : > { %v239_v29 = vmul.f32 %v236_v18, %v1135_v5  ;;  %v240_v30 = vmul.f32 %v236_v18, %v1137_v6  ;;  %v238_v36 = vmul.f32 %v236_v18, %v1132_v3  ;;  %v241_v37 = vmul.f32 %v236_v18, %v1141_v7 }
  0xc7   : > { %v243_v20 = vpop.permute.xlu1 %242 }
  0xc8   : > { %v259_v21 = vpop.permute.xlu0 %258 }
  0xcb   : > { %v245_v22 = vpop.permute.xlu1 %244 }
  0xcc   : > { %v255_v23 = vsel %vm252_vm0, %v243_v20, %v245_v22  ;;  %v247_v24 = vpop.permute.xlu0 %246 }
  0xcd   : > { %v254_v27 = vsel %vm252_vm0, %v245_v22, %v247_v24  ;;  %v262_v31 = vmul.f32 %v259_v21, %v255_v23 }
  0xce   : > { %v263_v32 = vmul.f32 %v259_v21, %v254_v27 }
  0xcf   : > { %v249_v25 = vpop.permute.xlu1 %248  ;;  %v266_v39 = vadd.f32 %v262_v31, %v239_v29 }
  0xd0   : > { %v1179_v26 = vpop.permute.xlu0 %308  ;;  %v253_v34 = vsel %vm252_vm0, %v247_v24, %v249_v25  ;;  %v256_v35 = vsel %vm252_vm0, %v249_v25, %v243_v20  ;;  %v267_v40 = vadd.f32 %v263_v32, %v240_v30 }
  0xd1   : > { %v261_v43 = vmul.f32 %v259_v21, %v256_v35  ;;  %v264_v44 = vmul.f32 %v259_v21, %v253_v34 }
  0xd3   : > { %v270_v28 = vpop.permute.xlu1 %269  ;;  %v265_v52 = vadd.f32 %v261_v43, %v238_v36  ;;  %v268_v53 = vadd.f32 %v264_v44, %v241_v37 }
  0xd4   : > { %v274_v33 = vpop.permute.xlu0 %273 }
  0xd7   : > { %v272_v38 = vpop.permute.xlu1 %271 }
  0xd8   : > { %v279_v41 = vsel %vm277_vm1, %v272_v38, %v274_v33  ;;  %v280_v42 = vsel %vm277_vm1, %v270_v28, %v272_v38  ;;  %v334_v56 = vpop.permute.xlu0 %333 }
  0xd9   : > { %v287_v45 = vmul.f32 %v284_v17, %v280_v42  ;;  %v288_v46 = vmul.f32 %v284_v17, %v279_v41 }
  0xdb   : > { %v291_v47 = vadd.f32 %v287_v45, %v266_v39  ;;  %v1190_v48 = vadd.f32 %v288_v46, %v267_v40  ;;  %v276_v49 = vpop.permute.xlu1 %275 }
  0xdc   : > { %v278_v50 = vsel %vm277_vm1, %v274_v33, %v276_v49  ;;  %v281_v51 = vsel %vm277_vm1, %v276_v49, %v270_v28  ;;  %v299_v61 = vpop.permute.xlu0 %298 }
  0xdd   : > { %v286_v54 = vmul.f32 %v284_v17, %v281_v51  ;;  %v289_v55 = vmul.f32 %v284_v17, %v278_v50 }
  0xdf   : > { %v290_v57 = vadd.f32 %v286_v54, %v265_v52  ;;  %v293_v58 = vadd.f32 %v289_v55, %v268_v53  ;;  %v295_v59 = vpop.permute.xlu1 %294 }
  0xe0   : > { %v359_v63 = vpop.permute.xlu0 %358 }
  0xe3   : > { %v297_v60 = vpop.permute.xlu1 %296 }
  0xe4   : > { %v324_v1 = vpop.permute.xlu0 %323  ;;  %v305_v18 = vsel %vm302_vm2, %v295_v59, %v297_v60  ;;  %v304_v22 = vsel %vm302_vm2, %v297_v60, %v299_v61 }
  0xe5   : > { %v312_v24 = vmul.f32 %v1179_v26, %v305_v18  ;;  %v313_v31 = vmul.f32 %v1179_v26, %v304_v22 }
  0xe7   : > { %v301_v62 = vpop.permute.xlu1 %300  ;;  %v316_v39 = vadd.f32 %v312_v24, %v291_v47  ;;  %v317_v51 = vadd.f32 %v313_v31, %v1190_v48 }
  0xe8   : > { %v1196_v4 = vpop.permute.xlu0 %383  ;;  %v306_v20 = vsel %vm302_vm2, %v301_v62, %v295_v59  ;;  %v303_v23 = vsel %vm302_vm2, %v299_v61, %v301_v62 }
  0xe9   : > { %v311_v25 = vmul.f32 %v1179_v26, %v306_v20  ;;  %v314_v32 = vmul.f32 %v1179_v26, %v303_v23 }
  0xeb   : > { %v320_v0 = vpop.permute.xlu1 %319  ;;  %v315_v40 = vadd.f32 %v311_v25, %v290_v57  ;;  %v318_v52 = vadd.f32 %v314_v32, %v293_v58 }
  0xec   : > { %v349_v10 = vpop.permute.xlu0 %348 }
  0xef   : > { %v322_v2 = vpop.permute.xlu1 %321 }
  0xf0   : > { %v1198_v12 = vpop.permute.xlu0 %408  ;;  %v330_v27 = vsel %vm327_vm3, %v320_v0, %v322_v2  ;;  %v329_v33 = vsel %vm327_vm3, %v322_v2, %v324_v1 }
  0xf1   : > { %v337_v35 = vmul.f32 %v334_v56, %v330_v27  ;;  %v338_v41 = vmul.f32 %v334_v56, %v329_v33 }
  0xf3   : > { %v326_v8 = vpop.permute.xlu1 %325  ;;  %v341_v53 = vadd.f32 %v337_v35, %v316_v39 }
  0xf4   : > { %v374_v14 = vpop.permute.xlu0 %373  ;;  %v331_v28 = vsel %vm327_vm3, %v326_v8, %v320_v0  ;;  %v328_v34 = vsel %vm327_vm3, %v324_v1, %v326_v8  ;;  %v342_v0 = vadd.f32 %v338_v41, %v317_v51 }
  0xf5   : > { %v336_v36 = vmul.f32 %v334_v56, %v331_v28  ;;  %v339_v42 = vmul.f32 %v334_v56, %v328_v34 }
  0xf7   : > { %v345_v9 = vpop.permute.xlu1 %344  ;;  %v340_v54 = vadd.f32 %v336_v36, %v315_v40  ;;  %v343_v1 = vadd.f32 %v339_v42, %v318_v52 }
  0xf8   : > { %v1201_v17 = vpop.permute.xlu0 %433 }
  0xfb   : > { %v347_v11 = vpop.permute.xlu1 %346 }
  0xfc   : > { %v399_v29 = vpop.permute.xlu0 %398  ;;  %v354_v37 = vsel %vm352_vm4, %v347_v11, %v349_v10  ;;  %v355_v38 = vsel %vm352_vm4, %v345_v9, %v347_v11 }
  0xfd   : > { %v361_v45 = vmul.f32 %v359_v63, %v355_v38  ;;  %v362_v46 = vmul.f32 %v359_v63, %v354_v37 }
  0xff   : > { %v351_v13 = vpop.permute.xlu1 %350  ;;  %v366_v2 = vadd.f32 %v362_v46, %v341_v53 }
 0x100   : > { %v353_v26 = vsel %vm352_vm4, %v349_v10, %v351_v13  ;;  %v356_v43 = vsel %vm352_vm4, %v351_v13, %v345_v9  ;;  %v420_v50 = vpop.permute.xlu0 %419 }
 0x101   : > { %v363_v55 = vmul.f32 %v359_v63, %v353_v26  ;;  %v364_v56 = vmul.f32 %v359_v63, %v356_v43  ;;  %v365_v63 = vadd.f32 %v361_v45, %v340_v54 }
 0x103   : > { %v370_v15 = vpop.permute.xlu1 %369  ;;  %v368_v18 = vadd.f32 %v364_v56, %v343_v1 }
 0x107   : > { %v372_v16 = vpop.permute.xlu1 %371 }
 0x108   : > { %v379_v49 = vsel %vm377_vm5, %v372_v16, %v374_v14  ;;  %v380_v47 = vsel %vm377_vm5, %v370_v15, %v372_v16  ;;  %v367_v16 = vadd.f32 %v363_v55, %v342_v0 }
 0x109   : > { %v386_v60 = vmul.f32 %v1196_v4, %v380_v47  ;;  %v387_v61 = vmul.f32 %v1196_v4, %v379_v49  ;;  %v457_v49 = vld [vmem:[#allocation5] sm:$0xff] }
 0x10b   : > { %v376_v21 = vpop.permute.xlu1 %375  ;;  %v390_v20 = vadd.f32 %v386_v60, %v365_v63 }
 0x10c   : > { %v378_v62 = vsel %vm377_vm5, %v374_v14, %v376_v21  ;;  %v381_v48 = vsel %vm377_vm5, %v376_v21, %v370_v15  ;;  %v424_v15 = vpop.permute.xlu0 %423  ;;  %v391_v21 = vadd.f32 %v387_v61, %v366_v2 }
 0x10d   : > { %v388_v13 = vmul.f32 %v1196_v4, %v378_v62  ;;  %v389_v14 = vmul.f32 %v1196_v4, %v381_v48 }
 0x10f   : > { %v395_v30 = vpop.permute.xlu1 %394  ;;  %v392_v31 = vadd.f32 %v388_v13, %v367_v16  ;;  %v393_v32 = vadd.f32 %v389_v14, %v368_v18 }
 0x110   : > { %v447_v33 = vpop.permute.xlu0 %446 }
 0x113   : > { %v397_v44 = vpop.permute.xlu1 %396 }
 0x114   : > { %v404_v57 = vsel %vm402_vm6, %v397_v44, %v399_v29  ;;  %v405_v59 = vsel %vm402_vm6, %v395_v30, %v397_v44 }
 0x115   : > { %v411_v8 = vmul.f32 %v1198_v12, %v405_v59  ;;  %v412_v9 = vmul.f32 %v1198_v12, %v404_v57 }
 0x117   : > { %v401_v58 = vpop.permute.xlu1 %400  ;;  %v415_v28 = vadd.f32 %v411_v8, %v390_v20 }
 0x118   : > { %v403_v10 = vsel %vm402_vm6, %v399_v29, %v401_v58  ;;  %v406_v11 = vsel %vm402_vm6, %v401_v58, %v395_v30  ;;  %v416_v30 = vadd.f32 %v412_v9, %v391_v21 }
 0x119   : > { %v413_v23 = vmul.f32 %v1198_v12, %v403_v10  ;;  %v414_v24 = vmul.f32 %v1198_v12, %v406_v11 }
 0x11b   : > { %v422_v22 = vpop.permute.xlu1 %421  ;;  %v417_v37 = vadd.f32 %v413_v23, %v392_v31  ;;  %v418_v39 = vadd.f32 %v414_v24, %v393_v32 }
 0x11c   : > { %v429_v25 = vsel %vm427_vm7, %v422_v22, %v424_v15  ;;  %v430_v27 = vsel %vm427_vm7, %v420_v50, %v422_v22 }
 0x11d   : > { %v436_v29 = vmul.f32 %v1201_v17, %v430_v27  ;;  %v437_v4 = vmul.f32 %v1201_v17, %v429_v25 }
 0x11f   : > { %v426_v34 = vpop.permute.xlu1 %425  ;;  %v441_v35 = vadd.f32 %v437_v4, %v416_v30  ;;  %v440_v36 = vadd.f32 %v436_v29, %v415_v28 }
 0x120   : > { %v428_v12 = vsel %vm427_vm7, %v424_v15, %v426_v34  ;;  %v431_v38 = vsel %vm427_vm7, %v426_v34, %v420_v50 }
 0x121   : > { %v438_v40 = vmul.f32 %v1201_v17, %v428_v12  ;;  %v439_v41 = vmul.f32 %v1201_v17, %v431_v38  ;;  %v450_v42 = vadd.f32 %v447_v33, %v441_v35  ;;  %v449_v26 = vadd.f32 %v447_v33, %v440_v36 }
 0x123   : > { %v454_v43 = vmax.f32 %v450_v42, 0.0  ;;  %v453_v44 = vmax.f32 %v449_v26, 0.0  ;;  %v443_v45 = vadd.f32 %v439_v41, %v418_v39  ;;  %v442_v46 = vadd.f32 %v438_v40, %v417_v37  ;;  %v610_v53 = vpop.permute.xlu1 %609 }
 0x125   : > { %492 = vmatprep.subr.mxu0 %v454_v43  ;;  %v452_v47 = vadd.f32 %v447_v33, %v443_v45  ;;  %v451_v51 = vadd.f32 %v447_v33, %v442_v46 }
 0x126   : > { %493 = vmatpush1.msra.mxu0 %v453_v44 }
 0x127   : > { %730 = vmatmul.mubr.msk.f32.vlgmr.msra.gmra.mxu0 %vm458_vm8, %v457_v49  ;;  %v456_v19 = vmax.f32 %v452_v47, 0.0  ;;  %v455_v50 = vmax.f32 %v451_v51, 0.0 }
 0x129   : > { %563 = vmatprep.subr.mxu1 %v456_v19 }
 0x12a   : > { %564 = vmatpush1.msra.mxu1 %v455_v50 }
 0x12b   : > { %731 = vmatmul.mubr.msk.f32.vlgmr.msra.gmra.mxu1 %vm458_vm8, %v457_v49 }
 0x1e7   : > { %v528_v17 = vpop.f32.mrf.mxu0 }
 0x1e8   : > { %v604_v52 = vadd.f32 %v528_v17, %v1132_v3 }
 0x1e9   : > { %v530_v54 = vpop.f32.mrf.mxu0 }
 0x1ea   : > { %v612_v55 = vadd.f32 %v610_v53, %v604_v52  ;;  %v605_v56 = vadd.f32 %v530_v54, %v1135_v5 }
 0x1eb   : > { %v599_v57 = vpop.f32.mrf.mxu1 }
 0x1ec   : > { %v616_v59 = vmax.f32 %v612_v55, 0.0  ;;  %v613_v60 = vadd.f32 %v610_v53, %v605_v56  ;;  %v606_v61 = vadd.f32 %v599_v57, %v1137_v6 }
 0x1ed   : > { %v601_v62 = vpop.f32.mrf.mxu1 }
 0x1ee   : > { %620 = vst [vmem:[%s226_s14] sm:$0xff] %v616_v59  ;;  %v617_v48 = vmax.f32 %v613_v60, 0.0  ;;  %v614_v58 = vadd.f32 %v610_v53, %v606_v61  ;;  %v607_v3 = vadd.f32 %v601_v62, %v1141_v7 }
 0x1f0   : > { %621 = vst [vmem:[%s226_s14 + $0x8] sm:$0xff] %v617_v48  ;;  %v618_v0 = vmax.f32 %v614_v58, 0.0  ;;  %v615_v5 = vadd.f32 %v610_v53, %v607_v3 }
 0x1f2   : > { %622 = vst [vmem:[%s226_s14 + $0x10] sm:$0xff] %v618_v0  ;;  %v619_v1 = vmax.f32 %v615_v5, 0.0 }
 0x1f4   : > { %623 = vst [vmem:[%s226_s14 + $0x18] sm:$0xff] %v619_v1 }
 0x1f5   : > { %892 = shalt.err (!%p889_p3)
}
 0x1f6   : > { %s893_s6 = scalar_lea.hbm %s637_s21, 512  ;;  %s897_s11 = scalar_lea.hbm %s1302_s4, 1024 }
 0x1f7   : > { %p894_p12 = scmp.ne.s32.totalorder %s637_s21, %s893_s6  ;;  %p898_p4 = scmp.lt.s32.totalorder %s637_s21, %s1302_s4 }
 0x1f8   : > { %p899_p6 = scmp.lt.s32.totalorder %s897_s11, %s893_s6 }
 0x1f9   : > { %p895_p5 = pnand %p894_p12, %p1319_p11 }
 0x1fa   : > { %p900_p8 = por %p899_p6, %p898_p4 }
 0x1fb   : > { %p896_p7 = pneg %p895_p5 }
 0x1fd   : > { %p901_p9 = pnand %p900_p8, %p896_p7 }
 0x1ff   : > { %904 = shalt.err (!%p901_p9)
}
 0x200   : > { %745 = dma.vmem_to_hbm [thread:$0]  (%p1319_p11), %s640_s5, 512, %s637_s21, %s625_s29  }
 0x201 PF: > { %s651_s13 = sand.u32 1, %s935_s15   ;;  %p1320_p13 = scmp.ne.s32.totalorder %s1308_s22, 0 }
 0x202   : > { %p1321_p10 = scmp.ge.s32.totalorder %s947_s18, 2  ;;  %s652_s14 = scalar_lea.sflag [#allocation4], %s651_s13 }
 0x204   : > { %p756_p1 = pnand %p1321_p10, %p1320_p13 }
 0x206   : > { %p757_p2 = pneg %p756_p1 }
 0x208   : > { %930 = dma.done.wait (%p757_p2), %s652_s14, 512  }
 0x209   : > { %932 = vsyncadd (%p757_p2), %s652_s14, 4294966784  ;;  %p18_p0 = scmp.ge.s32.totalorder %s1043_s26, 4   ;;  %s1322_s15 = smov %s939_s16 }
 0x20a   : > { %s1323_s16 = smov %s943_s17  ;;  %s1324_s17 = smov %s1070_s8 }
 0x20b   : > { %s1325_s18 = smov %s1043_s26  ;;  %20 = sbr.rel (!%p18_p0) target bundleno = 6 (0x6), region = 85 }
 0x210   :  { %657 = vsyncpa [#allocation3], 1 }
 0x211   :  { %659 = vsyncpa [#allocation3 + $0x1], 1 }
 0x212   :  { %660 = vsyncpa [#allocation6], 1 }
 0x213   :  { %661 = vsyncpa [#allocation4], 1 }
 0x214   :  { %663 = vsyncpa [#allocation4 + $0x1], 1 }

</bundles_post_ra>
